<compile_context>
chip_gen: v6e
topology: v6e:2x2x1
jax: 0.10.0
libtpu: 0.0.40
codegen_flags: <defaults>
</compile_context>

<pallas_src>
import functools

import jax
import jax.numpy as jnp
from jax.experimental import pallas as pl
from jax.experimental.pallas import tpu as pltpu


_LANE = 128
_SUBLANE = 8
_MAX_TILE_ELEMS = 1024 * 1024        # ~4 MiB per f32 (TI, TJ) intermediate
_STEP_OVERHEAD_ELEMS = 300_000       # ~600-cycle grid-step overhead, in pairs
_DEFAULT_TILE_I_CAP = 1024           # sublane (i) tile cap
_DEFAULT_TILE_J_CAP = 2048           # lane (j) tile cap
_VMEM_LIMIT_BYTES = 48 * 1024 * 1024


def _round_up(x: int, m: int) -> int:
    return (x + m - 1) // m * m


def _choose_tiles(n: int, tile_i_cap: int, tile_j_cap: int):
    """Pick (tile_i, tile_j, padded_i, padded_j) minimizing padded pair work
    plus per-grid-step overhead, under a VMEM-friendly tile-area cap."""
    ni = _round_up(n, _SUBLANE)
    nj = _round_up(n, _LANE)
    ti_cap = max(_SUBLANE, min(tile_i_cap, ni))
    tj_cap = max(_LANE, min(tile_j_cap, nj))
    best_key, best = None, None
    for ti in range(_SUBLANE, ti_cap + 1, _SUBLANE):
        pi = _round_up(ni, ti)
        gi = pi // ti
        for tj in range(_LANE, tj_cap + 1, _LANE):
            if ti * tj > _MAX_TILE_ELEMS:
                continue
            pj = _round_up(nj, tj)
            gj = pj // tj
            cost = pi * pj + gi * gj * _STEP_OVERHEAD_ELEMS
            key = (cost, gi * gj, -(ti * tj))
            if best_key is None or key < best_key:
                best_key, best = key, (ti, tj, pi, pj)
    return best


def _make_kernel(lower_is_better: bool, tile_j: int):
    n_groups = tile_j // _LANE

    def kernel(s_i_ref, t_i_ref, s_j_ref, t_j_ref, tanh_ref, cnt_ref):
        # Output blocks are resident across the (last, "arbitrary") j axis:
        # zero them on the first j step, accumulate afterwards.
        @pl.when(pl.program_id(2) == 0)
        def _():
            tanh_ref[...] = jnp.zeros_like(tanh_ref)
            cnt_ref[...] = jnp.zeros_like(cnt_ref)

        s_i = s_i_ref[...]    # (1, TI, 1)  pre-scaled by 0.5, i on sublanes
        t_i = t_i_ref[...]    # (1, TI, 1)  padded rows hold +/-inf sentinels
        s_j = s_j_ref[...]    # (1, 1, TJ)  pre-scaled by 0.5, j on lanes
        t_j = t_j_ref[...]    # (1, 1, TJ)  padded cols hold -/+inf sentinels

        # Preference mask; sentinel-padded targets can never satisfy it, so no
        # iota validity masks are needed for padded rows / columns.
        if lower_is_better:
            pref = t_i < t_j                       # (1, TI, TJ)
        else:
            pref = t_i > t_j

        # sigmoid(s_j - s_i) == 0.5*tanh(0.5*(s_j - s_i)) + 0.5.  The 0.5 scale
        # lives in the O(B*N) wrapper and the affine +0.5 is recovered from the
        # pair count in the epilogue, so the O(N^2) path is just one subtract,
        # one tanh (EUP) and two selects per pair.
        th = jnp.tanh(s_j - s_i)                   # (1, TI, TJ)
        contrib = jnp.where(pref, th, 0.0)
        hits = jnp.where(pref, 1.0, 0.0)

        # Reduce the lane (j) axis in 128-wide, vreg-aligned groups: pure VALU
        # adds (no cross-lane XLU work) into lane-dense (TI, 128) accumulators
        # with unmasked stores.  The final 128-lane reduce is an O(B*N) XLA
        # epilogue outside the kernel.
        acc_t = contrib[:, :, 0:_LANE]
        acc_c = hits[:, :, 0:_LANE]
        for g in range(1, n_groups):
            sl = slice(g * _LANE, (g + 1) * _LANE)
            acc_t = acc_t + contrib[:, :, sl]
            acc_c = acc_c + hits[:, :, sl]

        tanh_ref[...] += acc_t
        cnt_ref[...] += acc_c

    return kernel


@functools.partial(
    jax.jit, static_argnames=("lower_is_better", "max_tile_i", "max_tile_j"))
def pairwise_hinge_ranking_loss(scores, targets, lower_is_better: bool = True,
                                max_tile_i: int = _DEFAULT_TILE_I_CAP,
                                max_tile_j: int = _DEFAULT_TILE_J_CAP):
    if scores.ndim == 1:
        scores = scores[None, :]
        targets = targets[None, :]

    scores = scores.astype(jnp.float32)
    targets = targets.astype(jnp.float32)
    B, N = scores.shape

    tile_i, tile_j, np_i, np_j = _choose_tiles(N, max_tile_i, max_tile_j)
    gi = np_i // tile_i
    gj = np_j // tile_j

    # Hoist the 0.5 scale of the tanh-based sigmoid out of the O(N^2) kernel.
    half_scores = 0.5 * scores

    # Sentinel padding: padded i rows / j cols can never be preferred, so the
    # kernel needs no validity masks.  Padded scores stay 0 (finite).
    if lower_is_better:
        sent_i, sent_j = float("inf"), float("-inf")
    else:
        sent_i, sent_j = float("-inf"), float("inf")

    # i side: (B, Np_i, 1) columns (sublanes).  j side: (B, 1, Np_j) rows (lanes).
    scores_i = jnp.pad(half_scores, ((0, 0), (0, np_i - N)))[:, :, None]
    targets_i = jnp.pad(targets, ((0, 0), (0, np_i - N)),
                        constant_values=sent_i)[:, :, None]
    scores_j = jnp.pad(half_scores, ((0, 0), (0, np_j - N)))[:, None, :]
    targets_j = jnp.pad(targets, ((0, 0), (0, np_j - N)),
                        constant_values=sent_j)[:, None, :]

    kernel = _make_kernel(lower_is_better, tile_j)

    n_pairs = B * np_i * np_j
    cost = pl.CostEstimate(
        flops=int(6 * n_pairs),
        transcendentals=int(n_pairs),
        bytes_accessed=int(4 * (2 * B * np_i + 2 * B * gi * np_j
                                + 2 * B * np_i * _LANE)),
    )

    tanh_part, cnt_part = pl.pallas_call(
        kernel,
        out_shape=(jax.ShapeDtypeStruct((B, np_i, _LANE), jnp.float32),
                   jax.ShapeDtypeStruct((B, np_i, _LANE), jnp.float32)),
        grid_spec=pltpu.PrefetchScalarGridSpec(
            num_scalar_prefetch=0,
            grid=(B, gi, gj),
            in_specs=[
                pl.BlockSpec((1, tile_i, 1), lambda b, i, j: (b, i, 0)),
                pl.BlockSpec((1, tile_i, 1), lambda b, i, j: (b, i, 0)),
                pl.BlockSpec((1, 1, tile_j), lambda b, i, j: (b, 0, j)),
                pl.BlockSpec((1, 1, tile_j), lambda b, i, j: (b, 0, j)),
            ],
            out_specs=[
                pl.BlockSpec((1, tile_i, _LANE), lambda b, i, j: (b, i, 0)),
                pl.BlockSpec((1, tile_i, _LANE), lambda b, i, j: (b, i, 0)),
            ],
        ),
        compiler_params=pltpu.CompilerParams(
            dimension_semantics=("parallel", "parallel", "arbitrary"),
            vmem_limit_bytes=_VMEM_LIMIT_BYTES),
        cost_estimate=cost,
    )(scores_i, targets_i, scores_j, targets_j)

    # O(B*N) epilogue: finish the 128-lane reduce, fold the affine +0.5 back in
    # via the pair count, and do the single divide.
    tanh_sum = jnp.sum(tanh_part)
    num_pairs = jnp.sum(cnt_part)
    loss_sum = 0.5 * tanh_sum + 0.5 * num_pairs
    return loss_sum / jnp.maximum(num_pairs, jnp.float32(1.0))


def _reference(scores, targets, lower_is_better=True):
    # Pure-JAX reference mirroring the PyTorch forward, for verification.
    if scores.ndim == 1:
        scores = scores[None, :]
        targets = targets[None, :]
    s_i = scores[:, :, None]
    s_j = scores[:, None, :]
    t_i = targets[:, :, None]
    t_j = targets[:, None, :]
    if lower_is_better:
        mask = (t_i < t_j).astype(jnp.float32)
    else:
        mask = (t_i > t_j).astype(jnp.float32)
    inv_prob = jax.nn.sigmoid(s_j - s_i)
    num_pairs = jnp.maximum(mask.sum(), 1.0)
    return (mask * inv_prob).sum() / num_pairs


if __name__ == "__main__":
    key = jax.random.PRNGKey(0)
    k_s, k_t, k_s2, k_t2 = jax.random.split(key, 4)

    # Small shape matching the module's (batch, list_size) inputs.
    B, N = 2, 8
    scores = jax.random.normal(k_s, (B, N), dtype=jnp.float32)
    targets = jax.random.uniform(k_t, (B, N), dtype=jnp.float32)

    loss = pairwise_hinge_ranking_loss(scores, targets, lower_is_better=True)
    jax.block_until_ready(loss)
    ref = _reference(scores, targets, lower_is_better=True)
    assert jnp.allclose(loss, ref, atol=2e-5, rtol=2e-5), (loss, ref)

    # 1-D input path + higher-is-better branch.
    loss1d = pairwise_hinge_ranking_loss(scores[0], targets[0],
                                         lower_is_better=False)
    jax.block_until_ready(loss1d)
    ref1d = _reference(scores[0], targets[0], lower_is_better=False)
    assert jnp.allclose(loss1d, ref1d, atol=2e-5, rtol=2e-5), (loss1d, ref1d)

    # Moderate list size: exercises sentinel padding of the ragged lane tile.
    B2, N2 = 2, 600
    scores2 = jax.random.normal(k_s2, (B2, N2), dtype=jnp.float32)
    targets2 = jax.random.uniform(k_t2, (B2, N2), dtype=jnp.float32)
    loss2 = pairwise_hinge_ranking_loss(scores2, targets2, lower_is_better=True)
    jax.block_until_ready(loss2)
    ref2 = _reference(scores2, targets2, lower_is_better=True)
    assert jnp.allclose(loss2, ref2, atol=1e-4, rtol=1e-4), (loss2, ref2)

    # Same data with tiny tile caps: forces gi > 1 and gj > 1 so the resident
    # accumulation across the "arbitrary" j axis is exercised.
    loss3 = pairwise_hinge_ranking_loss(scores2, targets2, lower_is_better=True,
                                        max_tile_i=128, max_tile_j=256)
    jax.block_until_ready(loss3)
    assert jnp.allclose(loss3, ref2, atol=1e-4, rtol=1e-4), (loss3, ref2)

    print("KERNEL_OK")
</pallas_src>

<mosaic_0001>
module attributes {stable_mosaic.version = 11 : i64} {
  func.func @kernel(%arg0: i32, %arg1: i32, %arg2: i32, %arg3: memref<1x8x1xf32, #tpu.memory_space<vmem>>, %arg4: memref<1x8x1xf32, #tpu.memory_space<vmem>>, %arg5: memref<1x1x128xf32, #tpu.memory_space<vmem>>, %arg6: memref<1x1x128xf32, #tpu.memory_space<vmem>>, %arg7: memref<1x8x128xf32, #tpu.memory_space<vmem>>, %arg8: memref<1x8x128xf32, #tpu.memory_space<vmem>>) attributes {dimension_semantics = [#tpu.dimension_semantics<parallel>, #tpu.dimension_semantics<parallel>, #tpu.dimension_semantics<arbitrary>], iteration_bounds = array<i64: 2, 1, 1>, scalar_prefetch = 0 : i64, scratch_operands = 0 : i64, tpu.core_type = #tpu.core_type<tc>, window_params = [{transform_indices = @transform_0, window_bounds = array<i64: 1, 8, 1>}, {transform_indices = @transform_1, window_bounds = array<i64: 1, 8, 1>}, {transform_indices = @transform_2, window_bounds = array<i64: 1, 1, 128>}, {transform_indices = @transform_3, window_bounds = array<i64: 1, 1, 128>}, {transform_indices = @transform_4, window_bounds = array<i64: 1, 8, 128>}, {transform_indices = @transform_5, window_bounds = array<i64: 1, 8, 128>}]} {
    %c0_i32 = arith.constant 0 : i32
    %0 = arith.cmpi eq, %arg2, %c0_i32 : i32
    %1 = arith.extui %0 : i1 to i32
    %c0_i32_0 = arith.constant 0 : i32
    %2 = arith.cmpi ne, %1, %c0_i32_0 : i32
    scf.if %2 {
      %cst_26 = arith.constant 0.000000e+00 : f32
      %25 = vector.broadcast %cst_26 : f32 to vector<1x8x128xf32>
      %c0_27 = arith.constant 0 : index
      %c0_28 = arith.constant 0 : index
      %c0_29 = arith.constant 0 : index
      %26 = vector.load %arg7[%c0_27, %c0_28, %c0_29] : memref<1x8x128xf32, #tpu.memory_space<vmem>>, vector<1x8x128xf32>
      tpu.vector_store %arg7[%c0_27, %c0_28, %c0_29], %25 {strides = array<i32>} : memref<1x8x128xf32, #tpu.memory_space<vmem>>, vector<1x8x128xf32>,
      %cst_30 = arith.constant 0.000000e+00 : f32
      %27 = vector.broadcast %cst_30 : f32 to vector<1x8x128xf32>
      %c0_31 = arith.constant 0 : index
      %c0_32 = arith.constant 0 : index
      %c0_33 = arith.constant 0 : index
      %28 = vector.load %arg8[%c0_31, %c0_32, %c0_33] : memref<1x8x128xf32, #tpu.memory_space<vmem>>, vector<1x8x128xf32>
      tpu.vector_store %arg8[%c0_31, %c0_32, %c0_33], %27 {strides = array<i32>} : memref<1x8x128xf32, #tpu.memory_space<vmem>>, vector<1x8x128xf32>,
    } else {
    }
    %c0 = arith.constant 0 : index
    %c0_1 = arith.constant 0 : index
    %c0_2 = arith.constant 0 : index
    %3 = vector.load %arg3[%c0, %c0_1, %c0_2] : memref<1x8x1xf32, #tpu.memory_space<vmem>>, vector<1x8x1xf32>
    %c0_3 = arith.constant 0 : index
    %c0_4 = arith.constant 0 : index
    %c0_5 = arith.constant 0 : index
    %4 = vector.load %arg4[%c0_3, %c0_4, %c0_5] : memref<1x8x1xf32, #tpu.memory_space<vmem>>, vector<1x8x1xf32>
    %c0_6 = arith.constant 0 : index
    %c0_7 = arith.constant 0 : index
    %c0_8 = arith.constant 0 : index
    %5 = vector.load %arg5[%c0_6, %c0_7, %c0_8] : memref<1x1x128xf32, #tpu.memory_space<vmem>>, vector<1x1x128xf32>
    %c0_9 = arith.constant 0 : index
    %c0_10 = arith.constant 0 : index
    %c0_11 = arith.constant 0 : index
    %6 = vector.load %arg6[%c0_9, %c0_10, %c0_11] : memref<1x1x128xf32, #tpu.memory_space<vmem>>, vector<1x1x128xf32>
    %7 = vector.broadcast %4 : vector<1x8x1xf32> to vector<1x8x128xf32>
    %8 = vector.broadcast %6 : vector<1x1x128xf32> to vector<1x8x128xf32>
    %9 = arith.cmpf olt, %7, %8 : vector<1x8x128xf32>
    %10 = vector.broadcast %5 : vector<1x1x128xf32> to vector<1x8x128xf32>
    %11 = vector.broadcast %3 : vector<1x8x1xf32> to vector<1x8x128xf32>
    %12 = arith.subf %10, %11 : vector<1x8x128xf32>
    %13 = math.tanh %12 : vector<1x8x128xf32>
    %cst = arith.constant 0.000000e+00 : f32
    %14 = vector.broadcast %cst : f32 to vector<1x8x128xf32>
    %15 = arith.select %9, %13, %14 : vector<1x8x128xi1>, vector<1x8x128xf32>
    %cst_12 = arith.constant 1.000000e+00 : f32
    %cst_13 = arith.constant 0.000000e+00 : f32
    %16 = vector.broadcast %cst_12 : f32 to vector<1x8x128xf32>
    %17 = vector.broadcast %cst_13 : f32 to vector<1x8x128xf32>
    %18 = arith.select %9, %16, %17 : vector<1x8x128xi1>, vector<1x8x128xf32>
    %c0_14 = arith.constant 0 : index
    %c0_15 = arith.constant 0 : index
    %c0_16 = arith.constant 0 : index
    %19 = vector.load %arg7[%c0_14, %c0_15, %c0_16] : memref<1x8x128xf32, #tpu.memory_space<vmem>>, vector<1x8x128xf32>
    %20 = arith.addf %19, %15 : vector<1x8x128xf32>
    %c0_17 = arith.constant 0 : index
    %c0_18 = arith.constant 0 : index
    %c0_19 = arith.constant 0 : index
    %21 = vector.load %arg7[%c0_17, %c0_18, %c0_19] : memref<1x8x128xf32, #tpu.memory_space<vmem>>, vector<1x8x128xf32>
    tpu.vector_store %arg7[%c0_17, %c0_18, %c0_19], %20 {strides = array<i32>} : memref<1x8x128xf32, #tpu.memory_space<vmem>>, vector<1x8x128xf32>,
    %c0_20 = arith.constant 0 : index
    %c0_21 = arith.constant 0 : index
    %c0_22 = arith.constant 0 : index
    %22 = vector.load %arg8[%c0_20, %c0_21, %c0_22] : memref<1x8x128xf32, #tpu.memory_space<vmem>>, vector<1x8x128xf32>
    %23 = arith.addf %22, %18 : vector<1x8x128xf32>
    %c0_23 = arith.constant 0 : index
    %c0_24 = arith.constant 0 : index
    %c0_25 = arith.constant 0 : index
    %24 = vector.load %arg8[%c0_23, %c0_24, %c0_25] : memref<1x8x128xf32, #tpu.memory_space<vmem>>, vector<1x8x128xf32>
    tpu.vector_store %arg8[%c0_23, %c0_24, %c0_25], %23 {strides = array<i32>} : memref<1x8x128xf32, #tpu.memory_space<vmem>>, vector<1x8x128xf32>,
    return
  }
  func.func @transform_0(%arg0: i32, %arg1: i32, %arg2: i32) -> (i32, i32, i32) {
    %c0_i32 = arith.constant 0 : i32
    %c0_i32_0 = arith.constant 0 : i32
    return %arg0, %arg1, %c0_i32 : i32, i32, i32
  }
  func.func @transform_1(%arg0: i32, %arg1: i32, %arg2: i32) -> (i32, i32, i32) {
    %c0_i32 = arith.constant 0 : i32
    %c0_i32_0 = arith.constant 0 : i32
    return %arg0, %arg1, %c0_i32 : i32, i32, i32
  }
  func.func @transform_2(%arg0: i32, %arg1: i32, %arg2: i32) -> (i32, i32, i32) {
    %c0_i32 = arith.constant 0 : i32
    %c0_i32_0 = arith.constant 0 : i32
    return %arg0, %c0_i32, %arg2 : i32, i32, i32
  }
  func.func @transform_3(%arg0: i32, %arg1: i32, %arg2: i32) -> (i32, i32, i32) {
    %c0_i32 = arith.constant 0 : i32
    %c0_i32_0 = arith.constant 0 : i32
    return %arg0, %c0_i32, %arg2 : i32, i32, i32
  }
  func.func @transform_4(%arg0: i32, %arg1: i32, %arg2: i32) -> (i32, i32, i32) {
    %c0_i32 = arith.constant 0 : i32
    %c0_i32_0 = arith.constant 0 : i32
    return %arg0, %arg1, %c0_i32 : i32, i32, i32
  }
  func.func @transform_5(%arg0: i32, %arg1: i32, %arg2: i32) -> (i32, i32, i32) {
    %c0_i32 = arith.constant 0 : i32
    %c0_i32_0 = arith.constant 0 : i32
    return %arg0, %arg1, %c0_i32 : i32, i32, i32
  }
}

</mosaic_0001>

<bundles_post_ra>
// kernel: pairwise_hinge_ranking_loss.1
= control target key start
LH: loop header
LB: loop body
LE: loop exit
PB: predicated region body
PF: predicated region fallthrough
CT: control target
= control target key end

     0   :  { %s653_s18 = smov 0   ;;  %s655_s19 = smov 0   ;;  %s698_s0 = inlined_call_operand.vmem [shape: f32[2,8,1], index: 0, kind: input, shape index: {}]   ;;  %s699_s1 = inlined_call_operand.vmem [shape: f32[2,8,1], index: 1, kind: input, shape index: {}]   ;;  %s700_s2 = inlined_call_operand.vmem [shape: f32[2,1,128], index: 2, kind: input, shape index: {}]   ;;  %s701_s3 = inlined_call_operand.vmem [shape: f32[2,1,128], index: 3, kind: input, shape index: {}]   ;;  %s702_s4 = inlined_call_operand.vmem [shape: f32[2,8,128], index: 4, kind: output, shape index: {0}]   ;;  %s703_s5 = inlined_call_operand.vmem [shape: f32[2,8,128], index: 5, kind: output, shape index: {1}]  }
   0x1   :  { %s657_s20 = smov 0  }
   0x2 LB: > { %s35_s21 = sadd.s32 1, %s615_s19  ;;  %p559_p0 = scmp.ge.s32.totalorder %s619_s20, 1  ;;  %s619_s20 = sphi %s657_s20, %s16_s20   ;;  %s615_s19 = sphi %s655_s19, %s705_s19   ;;  %s611_s18 = sphi %s653_s18, %s704_s18  }
   0x3   : > { %p37_p1 = scmp.ge.s32.totalorder %s35_s21, 2  ;;  %p257_p2 = scmp.lt.s32.totalorder %s619_s20, 3 }
   0x5   : > { %s707_s21 = smov (%p37_p1, %s35_s21), 0  ;;  %p258_p3 = pnand %p559_p0, %p257_p2 }
   0x6   : > { %p315_p4 = scmp.lt.s32.totalorder (!%p258_p3), %s611_s18, 1 }
   0x7   : > { %261 = sbr.rel (%p258_p3) target bundleno = 158 (0x9e), region = 36 }
   0xc   : > { %v621_v0 = vmov 0   ;;  %s709_s18 = smov (!%p315_p4, %s611_s18), 1  ;;  %v622_v8 = vmov 0.0  }
   0xd   : > { %594 = vset.pattern.permute.xlu0 %v621_v0  ;;  %s560_s22 = sshll.u32 %s709_s18, 3  ;;  %s334_s6 = scalar_lea.vmem %s700_s2, %s709_s18 }
   0xe   : > { %s321_s25 = scalar_lea.vmem %s698_s0, %s560_s22  ;;  %s328_s28 = scalar_lea.vmem %s699_s1, %s560_s22  ;;  %v565_v3 = vld [vmem:[%s334_s6] ss:$0 sm:$0xff] }
   0xf   : > { %v361_v1 = vld [vmem:[%s321_s25] sm:$0xff]  ;;  %s340_s9 = scalar_lea.vmem %s701_s3, %s709_s18  ;;  %s354_s12 = scalar_lea.vmem %s703_s5, %s560_s22 }
  0x10   : > { %385 = vperm.xlu0 %594, %v361_v1   ;;  %v362_v2 = vld [vmem:[%s328_s28] sm:$0xff]  ;;  %s347_s15 = scalar_lea.vmem %s702_s4, %s560_s22 }
  0x11   : > { %v564_v6 = vld [vmem:[%s340_s9] ss:$0 sm:$0xff] }
  0x14   : > { %367 = vperm.xlu0 %594, %v362_v2  }
  0x8b   : > { %v386_v4 = vpop.permute.xlu0 %385 }
  0x8c   : > { %v388_v5 = vsub.f32 %v565_v3, %v386_v4 }
  0x8e   : > { %595 = vtanh.f32 %v388_v5 }
  0x8f   : > { %v368_v7 = vpop.permute.xlu0 %367 }
  0x90   : > { %vm376_vm0 = vcmp.lt.f32.partialorder %v368_v7, %v564_v6 }
  0x91   : > { %v391_v9 = vsel %vm376_vm0, 1.0, %v622_v8 }
  0x92   : > { %397 = vst [vmem:[%s354_s12] sm:$0xff] %v391_v9 }
  0x9b   : > { %v596_v10 = vpop.eup %595 }
  0x9c   : > { %v390_v11 = vsel %vm376_vm0, %v596_v10, 0.0 }
  0x9d   : > { %394 = vst [vmem:[%s347_s15] sm:$0xff] %v390_v11 }
  0x9e PF: > { %s16_s20 = sadd.s32 1, %s619_s20   ;;  %s704_s18 = smov %s615_s19 }
  0x9f   : > { %p13_p5 = scmp.ge.s32.totalorder %s16_s20, 4   ;;  %s705_s19 = smov %s707_s21 }
  0xa1   :  { %15 = sbr.rel (!%p13_p5) target bundleno = 2 (0x2), region = 91 }

</bundles_post_ra>
